<compile_context>
chip_gen: v7x
topology: tpu7x:2x2x1
jax: 0.10.0
libtpu: 0.0.40
codegen_flags: <defaults>
</compile_context>

<pallas_src>
import functools

import jax
import jax.numpy as jnp
from jax import lax
from jax.experimental import pallas as pl
from jax.experimental.pallas import tpu as pltpu


def _round_up(x: int, m: int) -> int:
    return ((x + m - 1) // m) * m


def _make_dot_kernel(pack: int, d: int):
    """Kernel over lane-packed tiles.

    u_ref, v_ref: (tbp, pack*d)  -- `pack` embedding rows of width `d` per
                                    128-lane row.
    b_ref, o_ref: (tbp, pack)    -- pre-combined bias / per-row result.
    """

    def dot_kernel(u_ref, v_ref, b_ref, o_ref):
        prod = u_ref[...].astype(jnp.float32) * v_ref[...].astype(jnp.float32)
        lane = lax.broadcasted_iota(jnp.int32, prod.shape, 1)   # (tbp, pack*d)
        col = lax.broadcasted_iota(jnp.int32, o_ref.shape, 1)   # (tbp, pack)
        acc = b_ref[...].astype(jnp.float32)
        # Static unroll over the packed segments (pack <= 128 // d): masked
        # select (VPU) + full-lane reduce (XLU); both units have slack since
        # the kernel is HBM-bound.
        for p in range(pack):
            seg = jnp.where((lane >= p * d) & (lane < (p + 1) * d), prod, 0.0)
            part = seg.sum(axis=-1, keepdims=True)              # (tbp, 1)
            acc = acc + jnp.where(col == p, part, 0.0)          # place in col p
        o_ref[...] = acc

    return dot_kernel


def dot_model_forward(user_emb_tbl, item_emb_tbl, user_bias_tbl, item_bias_tbl,
                      user_ids, item_ids, *, block_rows: int = 8192):
    """Equivalent of DotModel.forward(user_ids, item_ids) -> (B,) scores."""
    B = int(user_ids.shape[0])
    D = int(user_emb_tbl.shape[1])
    assert int(item_emb_tbl.shape[1]) == D

    # Lane packing factor: how many embedding rows fit in one 128-lane row.
    pack = 128 // D if (128 % D == 0 and D <= 128) else 1

    # Batch-tile size (in original batch rows).  Keep it a multiple of
    # pack*8 so the packed second-to-last block dim is sublane aligned, and
    # shrink it for tiny batches so we don't pad a B=8 demo to 8192 rows.
    align = pack * 8
    tile_rows = min(block_rows, _round_up(B, align))
    tile_rows = _round_up(tile_rows, align)
    B_pad = _round_up(B, tile_rows)

    # Pad the *ids* (with index 0) instead of padding the gathered arrays, so
    # the gathers directly produce aligned shapes; padded rows are sliced off
    # at the end (their contribution is discarded, values are irrelevant).
    pad = B_pad - B
    uid = jnp.pad(user_ids, (0, pad))
    iid = jnp.pad(item_ids, (0, pad))

    # Embedding lookups stay in XLA (glue).  Lane-pack the gathered rows
    # (free row-major reshape) and pre-combine the two bias streams.
    bp = B_pad // pack
    u = jnp.take(user_emb_tbl, uid, axis=0).reshape(bp, pack * D)
    v = jnp.take(item_emb_tbl, iid, axis=0).reshape(bp, pack * D)
    bias = (jnp.take(user_bias_tbl, uid, axis=0)
            + jnp.take(item_bias_tbl, iid, axis=0)).reshape(bp, pack)

    tbp = tile_rows // pack            # packed rows per tile (multiple of 8)
    grid = (B_pad // tile_rows,)

    out = pl.pallas_call(
        _make_dot_kernel(pack, D),
        out_shape=jax.ShapeDtypeStruct((bp, pack), jnp.float32),
        grid_spec=pl.GridSpec(
            grid=grid,
            in_specs=[
                pl.BlockSpec((tbp, pack * D), lambda i: (i, 0)),
                pl.BlockSpec((tbp, pack * D), lambda i: (i, 0)),
                pl.BlockSpec((tbp, pack), lambda i: (i, 0)),
            ],
            out_specs=pl.BlockSpec((tbp, pack), lambda i: (i, 0)),
        ),
        compiler_params=pltpu.CompilerParams(
            dimension_semantics=("parallel",)),
    )(u, v, bias)

    # PyTorch: dot + user_bias.squeeze() + item_bias.squeeze() -> shape (B,)
    return out.reshape(B_pad)[:B]


def init_params(key, num_users, num_items, embedding_dim):
    """Deterministic parameter init matching ScaledEmbedding / ZeroEmbedding."""
    ku, ki = jax.random.split(key)
    scale = 1.0 / embedding_dim
    user_emb = scale * jax.random.normal(ku, (num_users, embedding_dim), jnp.float32)
    item_emb = scale * jax.random.normal(ki, (num_items, embedding_dim), jnp.float32)
    user_bias = jnp.zeros((num_users, 1), jnp.float32)
    item_bias = jnp.zeros((num_items, 1), jnp.float32)
    return user_emb, item_emb, user_bias, item_bias


if __name__ == "__main__":
    num_users, num_items, embedding_dim = 10, 12, 32
    batch = 8

    key = jax.random.PRNGKey(0)
    kp, ku_ids, ki_ids = jax.random.split(key, 3)

    user_emb, item_emb, user_bias, item_bias = init_params(
        kp, num_users, num_items, embedding_dim)

    user_ids = jax.random.randint(ku_ids, (batch,), 0, num_users, jnp.int32)
    item_ids = jax.random.randint(ki_ids, (batch,), 0, num_items, jnp.int32)

    fwd = jax.jit(functools.partial(dot_model_forward, block_rows=8192))
    res = fwd(user_emb, item_emb, user_bias, item_bias, user_ids, item_ids)
    res = jax.block_until_ready(res)

    # Reference check (pure JAX) for the same semantics.
    u = jnp.take(user_emb, user_ids, axis=0)
    v = jnp.take(item_emb, item_ids, axis=0)
    ref = (u * v).sum(axis=1) + user_bias[user_ids, 0] + item_bias[item_ids, 0]
    assert res.shape == (batch,)
    assert jnp.allclose(res, ref, atol=1e-5, rtol=1e-5), (res, ref)

    print("KERNEL_OK")
</pallas_src>

<mosaic_0001>
module attributes {stable_mosaic.version = 11 : i64} {
  func.func @dot_kernel(%arg0: i32, %arg1: memref<8x128xf32, #tpu.memory_space<vmem>>, %arg2: memref<8x128xf32, #tpu.memory_space<vmem>>, %arg3: memref<8x4xf32, #tpu.memory_space<vmem>>, %arg4: memref<8x4xf32, #tpu.memory_space<vmem>>) attributes {dimension_semantics = [#tpu.dimension_semantics<parallel>], iteration_bounds = array<i64: 1>, scalar_prefetch = 0 : i64, scratch_operands = 0 : i64, tpu.core_type = #tpu.core_type<tc>, window_params = [{transform_indices = @transform_0, window_bounds = array<i64: 8, 128>}, {transform_indices = @transform_1, window_bounds = array<i64: 8, 128>}, {transform_indices = @transform_2, window_bounds = array<i64: 8, 4>}, {transform_indices = @transform_3, window_bounds = array<i64: 8, 4>}]} {
    %c0 = arith.constant 0 : index
    %c0_0 = arith.constant 0 : index
    %0 = vector.load %arg1[%c0, %c0_0] : memref<8x128xf32, #tpu.memory_space<vmem>>, vector<8x128xf32>
    %c0_1 = arith.constant 0 : index
    %c0_2 = arith.constant 0 : index
    %1 = vector.load %arg2[%c0_1, %c0_2] : memref<8x128xf32, #tpu.memory_space<vmem>>, vector<8x128xf32>
    %2 = arith.mulf %0, %1 : vector<8x128xf32>
    %3 = tpu.iota {dimensions = array<i32: 1>} : vector<8x128xi32>
    %4 = tpu.iota {dimensions = array<i32: 1>} : vector<8x4xi32>
    %c0_3 = arith.constant 0 : index
    %c0_4 = arith.constant 0 : index
    %5 = vector.load %arg3[%c0_3, %c0_4] : memref<8x4xf32, #tpu.memory_space<vmem>>, vector<8x4xf32>
    %c0_i32 = arith.constant 0 : i32
    %6 = vector.broadcast %c0_i32 : i32 to vector<8x128xi32>
    %7 = arith.cmpi sge, %3, %6 : vector<8x128xi32>
    %c32_i32 = arith.constant 32 : i32
    %8 = vector.broadcast %c32_i32 : i32 to vector<8x128xi32>
    %9 = arith.cmpi slt, %3, %8 : vector<8x128xi32>
    %10 = arith.andi %7, %9 : vector<8x128xi1>
    %cst = arith.constant 0.000000e+00 : f32
    %11 = vector.broadcast %cst : f32 to vector<8x128xf32>
    %12 = arith.select %10, %2, %11 : vector<8x128xi1>, vector<8x128xf32>
    %cst_5 = arith.constant dense<0.000000e+00> : vector<8xf32>
    %13 = vector.multi_reduction <add>, %12, %cst_5 [1] : vector<8x128xf32> to vector<8xf32>
    %14 = vector.shape_cast %13 : vector<8xf32> to vector<8x1xf32>
    %c0_i32_6 = arith.constant 0 : i32
    %15 = vector.broadcast %c0_i32_6 : i32 to vector<8x4xi32>
    %16 = arith.cmpi eq, %4, %15 : vector<8x4xi32>
    %cst_7 = arith.constant 0.000000e+00 : f32
    %17 = vector.shape_cast %14 : vector<8x1xf32> to vector<8x1xf32>
    %18 = vector.broadcast %17 : vector<8x1xf32> to vector<8x4xf32>
    %19 = vector.broadcast %cst_7 : f32 to vector<8x4xf32>
    %20 = arith.select %16, %18, %19 : vector<8x4xi1>, vector<8x4xf32>
    %21 = arith.addf %5, %20 : vector<8x4xf32>
    %c32_i32_8 = arith.constant 32 : i32
    %22 = vector.broadcast %c32_i32_8 : i32 to vector<8x128xi32>
    %23 = arith.cmpi sge, %3, %22 : vector<8x128xi32>
    %c64_i32 = arith.constant 64 : i32
    %24 = vector.broadcast %c64_i32 : i32 to vector<8x128xi32>
    %25 = arith.cmpi slt, %3, %24 : vector<8x128xi32>
    %26 = arith.andi %23, %25 : vector<8x128xi1>
    %cst_9 = arith.constant 0.000000e+00 : f32
    %27 = vector.broadcast %cst_9 : f32 to vector<8x128xf32>
    %28 = arith.select %26, %2, %27 : vector<8x128xi1>, vector<8x128xf32>
    %cst_10 = arith.constant dense<0.000000e+00> : vector<8xf32>
    %29 = vector.multi_reduction <add>, %28, %cst_10 [1] : vector<8x128xf32> to vector<8xf32>
    %30 = vector.shape_cast %29 : vector<8xf32> to vector<8x1xf32>
    %c1_i32 = arith.constant 1 : i32
    %31 = vector.broadcast %c1_i32 : i32 to vector<8x4xi32>
    %32 = arith.cmpi eq, %4, %31 : vector<8x4xi32>
    %cst_11 = arith.constant 0.000000e+00 : f32
    %33 = vector.shape_cast %30 : vector<8x1xf32> to vector<8x1xf32>
    %34 = vector.broadcast %33 : vector<8x1xf32> to vector<8x4xf32>
    %35 = vector.broadcast %cst_11 : f32 to vector<8x4xf32>
    %36 = arith.select %32, %34, %35 : vector<8x4xi1>, vector<8x4xf32>
    %37 = arith.addf %21, %36 : vector<8x4xf32>
    %c64_i32_12 = arith.constant 64 : i32
    %38 = vector.broadcast %c64_i32_12 : i32 to vector<8x128xi32>
    %39 = arith.cmpi sge, %3, %38 : vector<8x128xi32>
    %c96_i32 = arith.constant 96 : i32
    %40 = vector.broadcast %c96_i32 : i32 to vector<8x128xi32>
    %41 = arith.cmpi slt, %3, %40 : vector<8x128xi32>
    %42 = arith.andi %39, %41 : vector<8x128xi1>
    %cst_13 = arith.constant 0.000000e+00 : f32
    %43 = vector.broadcast %cst_13 : f32 to vector<8x128xf32>
    %44 = arith.select %42, %2, %43 : vector<8x128xi1>, vector<8x128xf32>
    %cst_14 = arith.constant dense<0.000000e+00> : vector<8xf32>
    %45 = vector.multi_reduction <add>, %44, %cst_14 [1] : vector<8x128xf32> to vector<8xf32>
    %46 = vector.shape_cast %45 : vector<8xf32> to vector<8x1xf32>
    %c2_i32 = arith.constant 2 : i32
    %47 = vector.broadcast %c2_i32 : i32 to vector<8x4xi32>
    %48 = arith.cmpi eq, %4, %47 : vector<8x4xi32>
    %cst_15 = arith.constant 0.000000e+00 : f32
    %49 = vector.shape_cast %46 : vector<8x1xf32> to vector<8x1xf32>
    %50 = vector.broadcast %49 : vector<8x1xf32> to vector<8x4xf32>
    %51 = vector.broadcast %cst_15 : f32 to vector<8x4xf32>
    %52 = arith.select %48, %50, %51 : vector<8x4xi1>, vector<8x4xf32>
    %53 = arith.addf %37, %52 : vector<8x4xf32>
    %c96_i32_16 = arith.constant 96 : i32
    %54 = vector.broadcast %c96_i32_16 : i32 to vector<8x128xi32>
    %55 = arith.cmpi sge, %3, %54 : vector<8x128xi32>
    %c128_i32 = arith.constant 128 : i32
    %56 = vector.broadcast %c128_i32 : i32 to vector<8x128xi32>
    %57 = arith.cmpi slt, %3, %56 : vector<8x128xi32>
    %58 = arith.andi %55, %57 : vector<8x128xi1>
    %cst_17 = arith.constant 0.000000e+00 : f32
    %59 = vector.broadcast %cst_17 : f32 to vector<8x128xf32>
    %60 = arith.select %58, %2, %59 : vector<8x128xi1>, vector<8x128xf32>
    %cst_18 = arith.constant dense<0.000000e+00> : vector<8xf32>
    %61 = vector.multi_reduction <add>, %60, %cst_18 [1] : vector<8x128xf32> to vector<8xf32>
    %62 = vector.shape_cast %61 : vector<8xf32> to vector<8x1xf32>
    %c3_i32 = arith.constant 3 : i32
    %63 = vector.broadcast %c3_i32 : i32 to vector<8x4xi32>
    %64 = arith.cmpi eq, %4, %63 : vector<8x4xi32>
    %cst_19 = arith.constant 0.000000e+00 : f32
    %65 = vector.shape_cast %62 : vector<8x1xf32> to vector<8x1xf32>
    %66 = vector.broadcast %65 : vector<8x1xf32> to vector<8x4xf32>
    %67 = vector.broadcast %cst_19 : f32 to vector<8x4xf32>
    %68 = arith.select %64, %66, %67 : vector<8x4xi1>, vector<8x4xf32>
    %69 = arith.addf %53, %68 : vector<8x4xf32>
    %c0_20 = arith.constant 0 : index
    %c0_21 = arith.constant 0 : index
    %70 = vector.load %arg4[%c0_20, %c0_21] : memref<8x4xf32, #tpu.memory_space<vmem>>, vector<8x4xf32>
    tpu.vector_store %arg4[%c0_20, %c0_21], %69 {strides = array<i32>} : memref<8x4xf32, #tpu.memory_space<vmem>>, vector<8x4xf32>,
    return
  }
  func.func @transform_0(%arg0: i32) -> (i32, i32) {
    %c0_i32 = arith.constant 0 : i32
    %c0_i32_0 = arith.constant 0 : i32
    return %arg0, %c0_i32 : i32, i32
  }
  func.func @transform_1(%arg0: i32) -> (i32, i32) {
    %c0_i32 = arith.constant 0 : i32
    %c0_i32_0 = arith.constant 0 : i32
    return %arg0, %c0_i32 : i32, i32
  }
  func.func @transform_2(%arg0: i32) -> (i32, i32) {
    %c0_i32 = arith.constant 0 : i32
    %c0_i32_0 = arith.constant 0 : i32
    return %arg0, %c0_i32 : i32, i32
  }
  func.func @transform_3(%arg0: i32) -> (i32, i32) {
    %c0_i32 = arith.constant 0 : i32
    %c0_i32_0 = arith.constant 0 : i32
    return %arg0, %c0_i32 : i32, i32
  }
}

</mosaic_0001>

<bundles_post_ra>
// kernel: dot_model_forward.1
= control target key start
LH: loop header
LB: loop body
LE: loop exit
PB: predicated region body
PF: predicated region fallthrough
CT: control target
= control target key end

     0   :  { %v17_v0 = vlaneseq  ;;  %vm56_vm12 = vcmask 31744   ;;  %s94_s0 = inlined_call_operand.vmem [shape: f32[8,128], index: 0, kind: input, shape index: {}]   ;;  %s95_s1 = inlined_call_operand.vmem [shape: f32[8,128], index: 1, kind: input, shape index: {}]   ;;  %s96_s2 = inlined_call_operand.vmem [shape: f32[8,4], index: 2, kind: input, shape index: {}]   ;;  %s97_s3 = inlined_call_operand.vmem [shape: f32[8,4], index: 3, kind: output, shape index: {}]  }
   0x1   :  { %v14_v1 = vld [vmem:[%s94_s0] sm:$0xff] }
   0x2   :  { %v15_v2 = vld [vmem:[%s95_s1] sm:$0xff]  ;;  %v18_v4 = vand.u32 127, %v17_v0 }
   0x3   :  { %v16_v3 = vmul.f32 %v15_v2, %v14_v1  ;;  %v19_v10 = vld [vmem:[%s96_s2] sm:$0xff] }
   0x4   :  { %vm21_vm0 = vcmp.lt.s32.totalorder %v18_v4, 32  ;;  %vm38_vm1 = vcmp.ge.s32.totalorder %v18_v4, 64  ;;  %vm39_vm2 = vcmp.lt.s32.totalorder %v18_v4, 96  ;;  %vm29_vm3 = vcmp.ge.s32.totalorder %v18_v4, 32 }
   0x5   :  { %v23_v5 = vsel %vm21_vm0, %v16_v3, 0.0  ;;  %vm40_vm4 = vmand %vm38_vm1, %vm39_vm2  ;;  %vm30_vm5 = vcmp.lt.s32.totalorder %v18_v4, 64  ;;  %vm47_vm6 = vcmp.ge.s32.totalorder %v18_v4, 96  ;;  %vm26_vm8 = vcmp.eq.s32.totalorder %v18_v4, 0 }
   0x6   :  { %24 = vadd.xlane.f32.xlu0 %v23_v5  ;;  %v41_v6 = vsel %vm40_vm4, %v16_v3, 0.0  ;;  %vm31_vm7 = vmand %vm29_vm3, %vm30_vm5  ;;  %v50_v8 = vsel %vm47_vm6, %v16_v3, 0.0  ;;  %vm35_vm9 = vcmp.eq.s32.totalorder %v18_v4, 1  ;;  %vm44_vm10 = vcmp.eq.s32.totalorder %v18_v4, 2 }
   0x7   :  { %42 = vadd.xlane.f32.xlu1 %v41_v6  ;;  %v32_v7 = vsel %vm31_vm7, %v16_v3, 0.0  ;;  %vm53_vm11 = vcmp.eq.s32.totalorder %v18_v4, 3 }
   0xa   :  { %33 = vadd.xlane.f32.xlu0 %v32_v7 }
   0xb   :  { %51 = vadd.xlane.f32.xlu1 %v50_v8 }
  0x93   :  { %v25_v9 = vpop.xlane.xlu0 %24 }
  0x94   :  { %v27_v11 = vsel %vm26_vm8, %v25_v9, 0.0  ;;  %v43_v12 = vpop.xlane.xlu1 %42 }
  0x95   :  { %v28_v13 = vadd.f32 %v27_v11, %v19_v10  ;;  %v45_v18 = vsel %vm44_vm10, %v43_v12, 0.0 }
  0x97   :  { %v34_v14 = vpop.xlane.xlu0 %33 }
  0x98   :  { %v36_v15 = vsel %vm35_vm9, %v34_v14, 0.0  ;;  %v52_v16 = vpop.xlane.xlu1 %51 }
  0x99   :  { %v37_v17 = vadd.f32 %v36_v15, %v28_v13  ;;  %v54_v19 = vsel %vm53_vm11, %v52_v16, 0.0 }
  0x9b   :  { %v46_v20 = vadd.f32 %v45_v18, %v37_v17 }
  0x9d   :  { %v55_v21 = vadd.f32 %v54_v19, %v46_v20 }
  0x9f   :  { %57 = vst.msk [vmem:[%s97_s3] sm:$0xff] %vm56_vm12, %v55_v21 }

</bundles_post_ra>
